<compile_context>
chip_gen: v7x
topology: tpu7x:2x2x1
jax: 0.10.0
libtpu: 0.0.40
codegen_flags: <defaults>
</compile_context>

<pallas_src>
import functools

import jax
import jax.numpy as jnp
from jax.experimental import pallas as pl
from jax.experimental.pallas import tpu as pltpu


def _neg_pearson_kernel(p_ref, t_ref, o_ref,
                        sx_ref, sy_ref, sxy_ref, sx2_ref, sy2_ref,
                        *, t_total, needs_mask):
    k = pl.program_id(1)          # reduction (T) grid index — last axis
    nk = pl.num_programs(1)

    @pl.when(k == 0)
    def _init():
        sx_ref[...] = jnp.zeros_like(sx_ref)
        sy_ref[...] = jnp.zeros_like(sy_ref)
        sxy_ref[...] = jnp.zeros_like(sxy_ref)
        sx2_ref[...] = jnp.zeros_like(sx2_ref)
        sy2_ref[...] = jnp.zeros_like(sy2_ref)

    # Single fused pass: read each operand once, form products on the fly.
    p = p_ref[...].astype(jnp.float32)    # (b_tile, t_tile)
    t = t_ref[...].astype(jnp.float32)

    if needs_mask:
        # Last T tile is partial: zero the padded lanes before reducing.
        t_tile = p.shape[1]
        lane = jax.lax.broadcasted_iota(jnp.int32, p.shape, 1) + k * t_tile
        valid = lane < t_total
        p = jnp.where(valid, p, 0.0)
        t = jnp.where(valid, t, 0.0)

    # Per-row partial moments; keepdims keeps everything lane-aligned (B, 1).
    sx_ref[...] += jnp.sum(p, axis=1, keepdims=True)
    sy_ref[...] += jnp.sum(t, axis=1, keepdims=True)
    sxy_ref[...] += jnp.sum(p * t, axis=1, keepdims=True)
    sx2_ref[...] += jnp.sum(p * p, axis=1, keepdims=True)
    sy2_ref[...] += jnp.sum(t * t, axis=1, keepdims=True)

    @pl.when(k == nk - 1)
    def _finalize():
        n = jnp.float32(t_total)
        sum_x, sum_y = sx_ref[...], sy_ref[...]
        sum_xy, sum_x2, sum_y2 = sxy_ref[...], sx2_ref[...], sy2_ref[...]
        num = n * sum_xy - sum_x * sum_y
        den = jnp.sqrt((n * sum_x2 - sum_x * sum_x) *
                       (n * sum_y2 - sum_y * sum_y))
        o_ref[...] = (1.0 - num / den).astype(o_ref.dtype)


def neg_pearson_loss(predictions, targets, *, b_tile=None, t_tile=None):
    """predictions: (B, 1, T) or (B, T); targets: (B, T). Returns scalar loss."""
    preds = jnp.squeeze(predictions, axis=1) if predictions.ndim == 3 else predictions
    B, T = preds.shape
    assert targets.shape == (B, T)

    # --- tile selection -----------------------------------------------------
    # Batch tile: full B if small (block dim == full dim is always legal),
    # otherwise a sublane-friendly 128-row tile.
    if b_tile is None:
        b_tile = B if B <= 128 else 128
    # T tile: ~4 MiB of f32 per input block => 2 inputs x 2 pipeline buffers
    # = 16 MiB, safe for v7x's 32 MiB scoped VMEM and large enough to hit the
    # HBM roofline on v5e/v6e.  Full T if it already fits; otherwise a
    # multiple of 128 lanes.
    if t_tile is None:
        budget_elems = (4 * 1024 * 1024) // 4
        max_t = max(128, budget_elems // max(b_tile, 1))
        t_tile = T if T <= max_t else (max_t // 128) * 128

    grid = (pl.cdiv(B, b_tile), pl.cdiv(T, t_tile))
    needs_mask = (T % t_tile) != 0

    kernel = functools.partial(_neg_pearson_kernel,
                               t_total=T, needs_mask=needs_mask)

    one_minus_r = pl.pallas_call(
        kernel,
        out_shape=jax.ShapeDtypeStruct((B, 1), jnp.float32),
        grid_spec=pltpu.PrefetchScalarGridSpec(
            num_scalar_prefetch=0,
            grid=grid,
            in_specs=[
                pl.BlockSpec((b_tile, t_tile), lambda b, k: (b, k)),
                pl.BlockSpec((b_tile, t_tile), lambda b, k: (b, k)),
            ],
            out_specs=pl.BlockSpec((b_tile, 1), lambda b, k: (b, 0)),
            scratch_shapes=[pltpu.VMEM((b_tile, 1), jnp.float32)] * 5,
        ),
        compiler_params=pltpu.CompilerParams(
            dimension_semantics=("parallel", "arbitrary"),
        ),
    )(preds, targets)

    # Tiny epilogue reduction over B in the wrapper (per-core partials idea).
    return jnp.mean(one_minus_r)


def _reference(predictions, targets):
    # Pure-JAX reference mirroring the PyTorch code (global normalization kept).
    p = jnp.squeeze(predictions, axis=1) if predictions.ndim == 3 else predictions
    p = p.astype(jnp.float32)
    t = targets.astype(jnp.float32)
    p = (p - jnp.mean(p)) / jnp.std(p, ddof=1)
    t = (t - jnp.mean(t)) / jnp.std(t, ddof=1)
    N = p.shape[1]
    sum_x = jnp.sum(p, axis=1)
    sum_y = jnp.sum(t, axis=1)
    sum_xy = jnp.sum(p * t, axis=1)
    sum_x2 = jnp.sum(p ** 2, axis=1)
    sum_y2 = jnp.sum(t ** 2, axis=1)
    pearson = (N * sum_xy - sum_x * sum_y) / jnp.sqrt(
        (N * sum_x2 - sum_x ** 2) * (N * sum_y2 - sum_y ** 2)
    )
    return jnp.mean(1.0 - pearson)


if __name__ == "__main__":
    key = jax.random.PRNGKey(0)

    # Case 1: small canonical shape (B=2, T=128), single tile.
    k1, k2, key = jax.random.split(key, 3)
    preds1 = jax.random.normal(k1, (2, 1, 128), dtype=jnp.float32)
    tgts1 = jax.random.normal(k2, (2, 128), dtype=jnp.float32)
    loss1 = neg_pearson_loss(preds1, tgts1)
    jax.block_until_ready(loss1)
    ref1 = _reference(preds1, tgts1)
    assert jnp.allclose(loss1, ref1, atol=1e-4, rtol=1e-4), (loss1, ref1)

    # Case 2: forced T tiling with a partial last T tile (exercises masking +
    # scratch accumulation across the reduction axis).
    k1, k2, key = jax.random.split(key, 3)
    preds2 = jax.random.normal(k1, (4, 1, 320), dtype=jnp.float32)
    tgts2 = jax.random.normal(k2, (4, 320), dtype=jnp.float32)
    loss2 = neg_pearson_loss(preds2, tgts2, t_tile=128)
    jax.block_until_ready(loss2)
    ref2 = _reference(preds2, tgts2)
    assert jnp.allclose(loss2, ref2, atol=1e-4, rtol=1e-4), (loss2, ref2)

    # Case 3: forced B tiling with a partial last B block (exercises the
    # "parallel" batch grid axis and clipped partial output writes).
    k1, k2, key = jax.random.split(key, 3)
    preds3 = jax.random.normal(k1, (10, 1, 256), dtype=jnp.float32)
    tgts3 = jax.random.normal(k2, (10, 256), dtype=jnp.float32)
    loss3 = neg_pearson_loss(preds3, tgts3, b_tile=8, t_tile=128)
    jax.block_until_ready(loss3)
    ref3 = _reference(preds3, tgts3)
    assert jnp.allclose(loss3, ref3, atol=1e-4, rtol=1e-4), (loss3, ref3)

    print("KERNEL_OK")
</pallas_src>

<mosaic_0001>
module attributes {stable_mosaic.version = 11 : i64} {
  func.func @_neg_pearson_kernel(%arg0: i32, %arg1: i32, %arg2: memref<2x128xf32, #tpu.memory_space<vmem>>, %arg3: memref<2x128xf32, #tpu.memory_space<vmem>>, %arg4: memref<2x1xf32, #tpu.memory_space<vmem>>, %arg5: memref<2x1xf32, #tpu.memory_space<vmem>>, %arg6: memref<2x1xf32, #tpu.memory_space<vmem>>, %arg7: memref<2x1xf32, #tpu.memory_space<vmem>>, %arg8: memref<2x1xf32, #tpu.memory_space<vmem>>, %arg9: memref<2x1xf32, #tpu.memory_space<vmem>>) attributes {dimension_semantics = [#tpu.dimension_semantics<parallel>, #tpu.dimension_semantics<arbitrary>], iteration_bounds = array<i64: 1, 1>, scalar_prefetch = 0 : i64, scratch_operands = 5 : i64, tpu.core_type = #tpu.core_type<tc>, window_params = [{transform_indices = @transform_0, window_bounds = array<i64: 2, 128>}, {transform_indices = @transform_1, window_bounds = array<i64: 2, 128>}, {transform_indices = @transform_2, window_bounds = array<i64: 2, 1>}]} {
    %c0_i32 = arith.constant 0 : i32
    %0 = arith.cmpi eq, %arg1, %c0_i32 : i32
    %1 = arith.extui %0 : i1 to i32
    %c0_i32_0 = arith.constant 0 : i32
    %2 = arith.cmpi ne, %1, %c0_i32_0 : i32
    scf.if %2 {
      %cst_30 = arith.constant 0.000000e+00 : f32
      %36 = vector.broadcast %cst_30 : f32 to vector<2x1xf32>
      %c0_31 = arith.constant 0 : index
      %c0_32 = arith.constant 0 : index
      %37 = vector.load %arg5[%c0_31, %c0_32] : memref<2x1xf32, #tpu.memory_space<vmem>>, vector<2x1xf32>
      tpu.vector_store %arg5[%c0_31, %c0_32], %36 {strides = array<i32>} : memref<2x1xf32, #tpu.memory_space<vmem>>, vector<2x1xf32>,
      %cst_33 = arith.constant 0.000000e+00 : f32
      %38 = vector.broadcast %cst_33 : f32 to vector<2x1xf32>
      %c0_34 = arith.constant 0 : index
      %c0_35 = arith.constant 0 : index
      %39 = vector.load %arg6[%c0_34, %c0_35] : memref<2x1xf32, #tpu.memory_space<vmem>>, vector<2x1xf32>
      tpu.vector_store %arg6[%c0_34, %c0_35], %38 {strides = array<i32>} : memref<2x1xf32, #tpu.memory_space<vmem>>, vector<2x1xf32>,
      %cst_36 = arith.constant 0.000000e+00 : f32
      %40 = vector.broadcast %cst_36 : f32 to vector<2x1xf32>
      %c0_37 = arith.constant 0 : index
      %c0_38 = arith.constant 0 : index
      %41 = vector.load %arg7[%c0_37, %c0_38] : memref<2x1xf32, #tpu.memory_space<vmem>>, vector<2x1xf32>
      tpu.vector_store %arg7[%c0_37, %c0_38], %40 {strides = array<i32>} : memref<2x1xf32, #tpu.memory_space<vmem>>, vector<2x1xf32>,
      %cst_39 = arith.constant 0.000000e+00 : f32
      %42 = vector.broadcast %cst_39 : f32 to vector<2x1xf32>
      %c0_40 = arith.constant 0 : index
      %c0_41 = arith.constant 0 : index
      %43 = vector.load %arg8[%c0_40, %c0_41] : memref<2x1xf32, #tpu.memory_space<vmem>>, vector<2x1xf32>
      tpu.vector_store %arg8[%c0_40, %c0_41], %42 {strides = array<i32>} : memref<2x1xf32, #tpu.memory_space<vmem>>, vector<2x1xf32>,
      %cst_42 = arith.constant 0.000000e+00 : f32
      %44 = vector.broadcast %cst_42 : f32 to vector<2x1xf32>
      %c0_43 = arith.constant 0 : index
      %c0_44 = arith.constant 0 : index
      %45 = vector.load %arg9[%c0_43, %c0_44] : memref<2x1xf32, #tpu.memory_space<vmem>>, vector<2x1xf32>
      tpu.vector_store %arg9[%c0_43, %c0_44], %44 {strides = array<i32>} : memref<2x1xf32, #tpu.memory_space<vmem>>, vector<2x1xf32>,
    } else {
    }
    %c0 = arith.constant 0 : index
    %c0_1 = arith.constant 0 : index
    %3 = vector.load %arg2[%c0, %c0_1] : memref<2x128xf32, #tpu.memory_space<vmem>>, vector<2x128xf32>
    %c0_2 = arith.constant 0 : index
    %c0_3 = arith.constant 0 : index
    %4 = vector.load %arg3[%c0_2, %c0_3] : memref<2x128xf32, #tpu.memory_space<vmem>>, vector<2x128xf32>
    %c0_4 = arith.constant 0 : index
    %c0_5 = arith.constant 0 : index
    %5 = vector.load %arg5[%c0_4, %c0_5] : memref<2x1xf32, #tpu.memory_space<vmem>>, vector<2x1xf32>
    %cst = arith.constant dense<0.000000e+00> : vector<2xf32>
    %6 = vector.multi_reduction <add>, %3, %cst [1] : vector<2x128xf32> to vector<2xf32>
    %7 = vector.shape_cast %6 : vector<2xf32> to vector<2x1xf32>
    %8 = arith.addf %5, %7 : vector<2x1xf32>
    %c0_6 = arith.constant 0 : index
    %c0_7 = arith.constant 0 : index
    %9 = vector.load %arg5[%c0_6, %c0_7] : memref<2x1xf32, #tpu.memory_space<vmem>>, vector<2x1xf32>
    tpu.vector_store %arg5[%c0_6, %c0_7], %8 {strides = array<i32>} : memref<2x1xf32, #tpu.memory_space<vmem>>, vector<2x1xf32>,
    %c0_8 = arith.constant 0 : index
    %c0_9 = arith.constant 0 : index
    %10 = vector.load %arg6[%c0_8, %c0_9] : memref<2x1xf32, #tpu.memory_space<vmem>>, vector<2x1xf32>
    %cst_10 = arith.constant dense<0.000000e+00> : vector<2xf32>
    %11 = vector.multi_reduction <add>, %4, %cst_10 [1] : vector<2x128xf32> to vector<2xf32>
    %12 = vector.shape_cast %11 : vector<2xf32> to vector<2x1xf32>
    %13 = arith.addf %10, %12 : vector<2x1xf32>
    %c0_11 = arith.constant 0 : index
    %c0_12 = arith.constant 0 : index
    %14 = vector.load %arg6[%c0_11, %c0_12] : memref<2x1xf32, #tpu.memory_space<vmem>>, vector<2x1xf32>
    tpu.vector_store %arg6[%c0_11, %c0_12], %13 {strides = array<i32>} : memref<2x1xf32, #tpu.memory_space<vmem>>, vector<2x1xf32>,
    %c0_13 = arith.constant 0 : index
    %c0_14 = arith.constant 0 : index
    %15 = vector.load %arg7[%c0_13, %c0_14] : memref<2x1xf32, #tpu.memory_space<vmem>>, vector<2x1xf32>
    %16 = arith.mulf %3, %4 : vector<2x128xf32>
    %cst_15 = arith.constant dense<0.000000e+00> : vector<2xf32>
    %17 = vector.multi_reduction <add>, %16, %cst_15 [1] : vector<2x128xf32> to vector<2xf32>
    %18 = vector.shape_cast %17 : vector<2xf32> to vector<2x1xf32>
    %19 = arith.addf %15, %18 : vector<2x1xf32>
    %c0_16 = arith.constant 0 : index
    %c0_17 = arith.constant 0 : index
    %20 = vector.load %arg7[%c0_16, %c0_17] : memref<2x1xf32, #tpu.memory_space<vmem>>, vector<2x1xf32>
    tpu.vector_store %arg7[%c0_16, %c0_17], %19 {strides = array<i32>} : memref<2x1xf32, #tpu.memory_space<vmem>>, vector<2x1xf32>,
    %c0_18 = arith.constant 0 : index
    %c0_19 = arith.constant 0 : index
    %21 = vector.load %arg8[%c0_18, %c0_19] : memref<2x1xf32, #tpu.memory_space<vmem>>, vector<2x1xf32>
    %22 = arith.mulf %3, %3 : vector<2x128xf32>
    %cst_20 = arith.constant dense<0.000000e+00> : vector<2xf32>
    %23 = vector.multi_reduction <add>, %22, %cst_20 [1] : vector<2x128xf32> to vector<2xf32>
    %24 = vector.shape_cast %23 : vector<2xf32> to vector<2x1xf32>
    %25 = arith.addf %21, %24 : vector<2x1xf32>
    %c0_21 = arith.constant 0 : index
    %c0_22 = arith.constant 0 : index
    %26 = vector.load %arg8[%c0_21, %c0_22] : memref<2x1xf32, #tpu.memory_space<vmem>>, vector<2x1xf32>
    tpu.vector_store %arg8[%c0_21, %c0_22], %25 {strides = array<i32>} : memref<2x1xf32, #tpu.memory_space<vmem>>, vector<2x1xf32>,
    %c0_23 = arith.constant 0 : index
    %c0_24 = arith.constant 0 : index
    %27 = vector.load %arg9[%c0_23, %c0_24] : memref<2x1xf32, #tpu.memory_space<vmem>>, vector<2x1xf32>
    %28 = arith.mulf %4, %4 : vector<2x128xf32>
    %cst_25 = arith.constant dense<0.000000e+00> : vector<2xf32>
    %29 = vector.multi_reduction <add>, %28, %cst_25 [1] : vector<2x128xf32> to vector<2xf32>
    %30 = vector.shape_cast %29 : vector<2xf32> to vector<2x1xf32>
    %31 = arith.addf %27, %30 : vector<2x1xf32>
    %c0_26 = arith.constant 0 : index
    %c0_27 = arith.constant 0 : index
    %32 = vector.load %arg9[%c0_26, %c0_27] : memref<2x1xf32, #tpu.memory_space<vmem>>, vector<2x1xf32>
    tpu.vector_store %arg9[%c0_26, %c0_27], %31 {strides = array<i32>} : memref<2x1xf32, #tpu.memory_space<vmem>>, vector<2x1xf32>,
    %c0_i32_28 = arith.constant 0 : i32
    %33 = arith.cmpi eq, %arg1, %c0_i32_28 : i32
    %34 = arith.extui %33 : i1 to i32
    %c0_i32_29 = arith.constant 0 : i32
    %35 = arith.cmpi ne, %34, %c0_i32_29 : i32
    scf.if %35 {
      %c0_30 = arith.constant 0 : index
      %c0_31 = arith.constant 0 : index
      %36 = vector.load %arg5[%c0_30, %c0_31] : memref<2x1xf32, #tpu.memory_space<vmem>>, vector<2x1xf32>
      %c0_32 = arith.constant 0 : index
      %c0_33 = arith.constant 0 : index
      %37 = vector.load %arg6[%c0_32, %c0_33] : memref<2x1xf32, #tpu.memory_space<vmem>>, vector<2x1xf32>
      %c0_34 = arith.constant 0 : index
      %c0_35 = arith.constant 0 : index
      %38 = vector.load %arg7[%c0_34, %c0_35] : memref<2x1xf32, #tpu.memory_space<vmem>>, vector<2x1xf32>
      %c0_36 = arith.constant 0 : index
      %c0_37 = arith.constant 0 : index
      %39 = vector.load %arg8[%c0_36, %c0_37] : memref<2x1xf32, #tpu.memory_space<vmem>>, vector<2x1xf32>
      %c0_38 = arith.constant 0 : index
      %c0_39 = arith.constant 0 : index
      %40 = vector.load %arg9[%c0_38, %c0_39] : memref<2x1xf32, #tpu.memory_space<vmem>>, vector<2x1xf32>
      %cst_40 = arith.constant 1.280000e+02 : f32
      %41 = vector.broadcast %cst_40 : f32 to vector<2x1xf32>
      %42 = arith.mulf %41, %38 : vector<2x1xf32>
      %43 = arith.mulf %36, %37 : vector<2x1xf32>
      %44 = arith.subf %42, %43 : vector<2x1xf32>
      %cst_41 = arith.constant 1.280000e+02 : f32
      %45 = vector.broadcast %cst_41 : f32 to vector<2x1xf32>
      %46 = arith.mulf %45, %39 : vector<2x1xf32>
      %47 = arith.mulf %36, %36 : vector<2x1xf32>
      %48 = arith.subf %46, %47 : vector<2x1xf32>
      %cst_42 = arith.constant 1.280000e+02 : f32
      %49 = vector.broadcast %cst_42 : f32 to vector<2x1xf32>
      %50 = arith.mulf %49, %40 : vector<2x1xf32>
      %51 = arith.mulf %37, %37 : vector<2x1xf32>
      %52 = arith.subf %50, %51 : vector<2x1xf32>
      %53 = arith.mulf %48, %52 : vector<2x1xf32>
      %54 = math.sqrt %53 : vector<2x1xf32>
      %55 = arith.divf %44, %54 : vector<2x1xf32>
      %cst_43 = arith.constant 1.000000e+00 : f32
      %56 = vector.broadcast %cst_43 : f32 to vector<2x1xf32>
      %57 = arith.subf %56, %55 : vector<2x1xf32>
      %c0_44 = arith.constant 0 : index
      %c0_45 = arith.constant 0 : index
      %58 = vector.load %arg4[%c0_44, %c0_45] : memref<2x1xf32, #tpu.memory_space<vmem>>, vector<2x1xf32>
      tpu.vector_store %arg4[%c0_44, %c0_45], %57 {strides = array<i32>} : memref<2x1xf32, #tpu.memory_space<vmem>>, vector<2x1xf32>,
    } else {
    }
    return
  }
  func.func @transform_0(%arg0: i32, %arg1: i32) -> (i32, i32) {
    %c0_i32 = arith.constant 0 : i32
    return %arg0, %arg1 : i32, i32
  }
  func.func @transform_1(%arg0: i32, %arg1: i32) -> (i32, i32) {
    %c0_i32 = arith.constant 0 : i32
    return %arg0, %arg1 : i32, i32
  }
  func.func @transform_2(%arg0: i32, %arg1: i32) -> (i32, i32) {
    %c0_i32 = arith.constant 0 : i32
    %c0_i32_0 = arith.constant 0 : i32
    return %arg0, %c0_i32 : i32, i32
  }
}

</mosaic_0001>

<bundles_post_ra>
// kernel: tpu_custom_call.1
= control target key start
LH: loop header
LB: loop body
LE: loop exit
PB: predicated region body
PF: predicated region fallthrough
CT: control target
= control target key end

     0   :  { %7 = vsyncpa [#allocation8], 0  ;;  %s134_s9 = smov [#allocation7]   ;;  %s180_s0 = inlined_call_operand.hbm [shape: f32[2,128], index: 0, kind: input, shape index: {}]   ;;  %s181_s1 = inlined_call_operand.vmem [shape: f32[2,128], index: 1, kind: input, shape index: {}]   ;;  %s182_s2 = inlined_call_operand.vmem [shape: f32[2,1], index: 2, kind: output, shape index: {}]  }
   0x1   :  { %s14_s10 = sshll.u32 %s134_s9, 4  ;;  %s110_s13 = scalar_lea.hbm %s180_s0, 32  ;;  %s15_s10 = int_to_ptr.vmem [resolvable:$true] %s14_s10 }
   0x2   :  { %p111_p0 = scmp.ne.s32.totalorder %s180_s0, %s110_s13  ;;  %p114_p1 = scmp.lt.u32.totalorder %s110_s13, %s180_s0 }
   0x4   :  { %p116_p2 = pnand %p114_p1, %p111_p0 }
   0x6   :  { %119 = shalt.err (!%p116_p2)
}
   0x7   :  { %s120_s18 = scalar_lea.vmem %s15_s10, 32  ;;  %p125_p4 = scmp.lt.s32.totalorder %s15_s10, %s15_s10 }
   0x8   :  { %p121_p3 = scmp.ne.s32.totalorder %s15_s10, %s120_s18  ;;  %p126_p5 = scmp.lt.s32.totalorder %s120_s18, %s120_s18 }
   0xa   :  { %p127_p6 = por %p126_p5, %p125_p4 }
   0xc   :  { %p128_p7 = pnand %p127_p6, %p121_p3 }
   0xe   :  { %131 = shalt.err (!%p128_p7)
}
   0xf   :  { %17 = dma.hbm_to_vmem [thread:$0]  %s180_s0, 32, %s15_s10, [#allocation8]  }
  0x10   :  { %132 = dma.done.wait [#allocation8], 32  }
  0x11   :  { %133 = vsyncadd [#allocation8], 4294967264  ;;  %vm27_vm0 = vcmask 1024   ;;  %v135_v0 = vmov 0.0   ;;  %vm36_vm1 = vcmask 1041408  }
  0x12   :  { %28 = vst.msk [vmem:[#allocation2] sm:$0x3] %vm27_vm0, %v135_v0  ;;  %29 = vst.msk [vmem:[#allocation3] sm:$0x3] %vm27_vm0, %v135_v0  ;;  %v33_v1 = vld [vmem:[#allocation7] sm:$0x3] }
  0x13   :  { %30 = vst.msk [vmem:[#allocation4] sm:$0x3] %vm27_vm0, %v135_v0  ;;  %31 = vst.msk [vmem:[#allocation5] sm:$0x3] %vm27_vm0, %v135_v0  ;;  %v34_v2 = vld [vmem:[%s181_s1] sm:$0x3]  ;;  %v57_v4 = vmul.f32 %v33_v1, %v33_v1 }
  0x14   :  { %32 = vst.msk [vmem:[#allocation6] sm:$0x3] %vm27_vm0, %v135_v0  ;;  %v37_v3 = vsel %vm36_vm1, %v33_v1, 0.0  ;;  %v64_v5 = vmul.f32 %v34_v2, %v34_v2  ;;  %v44_v7 = vsel %vm36_vm1, %v34_v2, 0.0  ;;  %v50_v8 = vmul.f32 %v34_v2, %v33_v1 }
  0x15   :  { %38 = vadd.xlane.f32.xlu0 %v37_v3  ;;  %v58_v6 = vsel %vm36_vm1, %v57_v4, 0.0 }
  0x16   :  { %59 = vadd.xlane.f32.xlu1 %v58_v6  ;;  %v65_v9 = vsel %vm36_vm1, %v64_v5, 0.0  ;;  %v51_v10 = vsel %vm36_vm1, %v50_v8, 0.0 }
  0x19   :  { %45 = vadd.xlane.f32.xlu0 %v44_v7  ;;  %v35_v11 = vld [vmem:[#allocation2] sm:$0x3]  ;;  %v43_v16 = vld [vmem:[#allocation3] sm:$0x3] }
  0x1a   :  { %66 = vadd.xlane.f32.xlu1 %v65_v9  ;;  %v56_v13 = vld [vmem:[#allocation5] sm:$0x3]  ;;  %v49_v22 = vld [vmem:[#allocation4] sm:$0x3] }
  0x1b   :  { %v63_v19 = vld [vmem:[#allocation6] sm:$0x3] }
  0x1d   :  { %52 = vadd.xlane.f32.xlu0 %v51_v10 }
  0xa2   :  { %v39_v12 = vpop.xlane.xlu0 %38 }
  0xa3   :  { %v40_v14 = vadd.f32 %v39_v12, %v35_v11  ;;  %v60_v15 = vpop.xlane.xlu1 %59 }
  0xa4   :  { %v61_v17 = vadd.f32 %v60_v15, %v56_v13 }
  0xa5   :  { %42 = vst.msk [vmem:[#allocation2] sm:$0x3] %vm27_vm0, %v40_v14 }
  0xa6   :  { %v46_v18 = vpop.xlane.xlu0 %45  ;;  %62 = vst.msk [vmem:[#allocation5] sm:$0x3] %vm27_vm0, %v61_v17 }
  0xa7   :  { %v47_v20 = vadd.f32 %v46_v18, %v43_v16  ;;  %v67_v21 = vpop.xlane.xlu1 %66 }
  0xa8   :  { %v68_v23 = vadd.f32 %v67_v21, %v63_v19 }
  0xa9   :  { %48 = vst.msk [vmem:[#allocation3] sm:$0x3] %vm27_vm0, %v47_v20 }
  0xaa   :  { %v53_v24 = vpop.xlane.xlu0 %52  ;;  %69 = vst.msk [vmem:[#allocation6] sm:$0x3] %vm27_vm0, %v68_v23 }
  0xab   :  { %v54_v25 = vadd.f32 %v53_v24, %v49_v22 }
  0xac   :  { %v73_v26 = vld [vmem:[#allocation2] sm:$0x3] }
  0xad   :  { %55 = vst.msk [vmem:[#allocation4] sm:$0x3] %vm27_vm0, %v54_v25  ;;  %v76_v27 = vld [vmem:[#allocation5] sm:$0x3]  ;;  %v82_v29 = vmul.f32 %v73_v26, %v73_v26 }
  0xae   :  { %v81_v30 = vmul.f32 128.0, %v76_v27 }
  0xb0   :  { %v74_v28 = vld [vmem:[#allocation3] sm:$0x3]  ;;  %v83_v34 = vsub.f32 %v81_v30, %v82_v29 }
  0xb1   :  { %v85_v31 = vmul.f32 %v74_v28, %v74_v28  ;;  %v77_v32 = vld [vmem:[#allocation6] sm:$0x3]  ;;  %v79_v44 = vmul.f32 %v74_v28, %v73_v26 }
  0xb2   :  { %v84_v33 = vmul.f32 128.0, %v77_v32 }
  0xb4   :  { %v86_v35 = vsub.f32 %v84_v33, %v85_v31  ;;  %v75_v42 = vld [vmem:[#allocation4] sm:$0x3] }
  0xb5   :  { %v78_v43 = vmul.f32 128.0, %v75_v42 }
  0xb6   :  { %v87_v36 = vmul.f32 %v86_v35, %v83_v34 }
  0xb7   :  { %v80_v45 = vsub.f32 %v78_v43, %v79_v44 }
  0xb8   :  { %106 = vrsqrt.f32 %v87_v36  ;;  %vm90_vm2 = vcmp.eq.f32.partialorder %v87_v36, inf  ;;  %v93_v39 = vand.u32 2147483648, %v87_v36  ;;  %vm92_vm3 = vcmp.eq.f32.partialorder %v87_v36, 0.0 }
  0xc2   :  { %v107_v37 = vpop.eup %106 }
  0xc3   :  { %v89_v38 = vmul.f32 %v107_v37, %v87_v36 }
  0xc5   :  { %v91_v40 = vsel %vm90_vm2, %v87_v36, %v89_v38 }
  0xc6   :  { %v94_v41 = vsel %vm92_vm3, %v93_v39, %v91_v40 }
  0xc7   :  { %108 = vrcp.f32 %v94_v41 }
  0xd1   :  { %v109_v46 = vpop.eup %108 }
  0xd2   :  { %v96_v47 = vmul.f32 %v109_v46, %v80_v45 }
  0xd4   :  { %v97_v48 = vsub.f32 1.0, %v96_v47 }
  0xd6   :  { %98 = vst.msk [vmem:[%s182_s2] sm:$0x3] %vm27_vm0, %v97_v48 }
  0xd7   :  { %103 = vsyncpa [#allocation8], 1 }

</bundles_post_ra>
